<compile_context>
chip_gen: v5e
topology: v5e:2x2
jax: 0.10.0
libtpu: 0.0.40
codegen_flags: <defaults>
</compile_context>

<pallas_src>
import functools
import math

import jax
import jax.numpy as jnp
from jax.experimental import pallas as pl
from jax.experimental.pallas import tpu as pltpu


def _round_up(x, m):
    return ((x + m - 1) // m) * m


def _fourier_kernel(pos_ref, b_ref, out_ref, *, pos_dim):
    # pos_ref: (tile_n, pos_dim), b_ref: (pos_dim, enc_dim),
    # out_ref: (tile_n, 2 * enc_dim)
    pos = pos_ref[...].astype(jnp.float32)
    b = b_ref[...].astype(jnp.float32)

    # Tiny contraction -> unrolled VPU broadcast-FMA (no MXU push/pop latency,
    # no relayout of the 4-lane / 16-lane operands).
    pe = pos[:, 0:1] * b[0:1, :]
    for k in range(1, pos_dim):
        pe = pe + pos[:, k : k + 1] * b[k : k + 1, :]

    # sin/cos in f32 (v5e VPU has no bf16); concatenate once and do a single
    # store of the full output tile.
    s = jnp.sin(pe)
    c = jnp.cos(pe)
    out_ref[...] = jnp.concatenate([s, c], axis=-1).astype(out_ref.dtype)


def fourier_features(pos, B, *, tile_n=None, out_dtype=None):
    """pos: (..., pos_dim); B: (pos_dim, enc_dim). Returns (..., 2*enc_dim)."""
    pos_dim, enc_dim = B.shape
    f_dim = 2 * enc_dim
    lead = pos.shape[:-1]
    n = math.prod(lead) if lead else 1
    if out_dtype is None:
        out_dtype = pos.dtype

    pos2d = pos.reshape(n, pos_dim)

    # Real tiling default: multiple of 8 sublanes, capped so double-buffered
    # (pos + out) blocks stay small on every VMEM budget, while still being
    # large enough (>=512 rows) to sit near the HBM roofline.
    if tile_n is None:
        tile_n = 2048
    tile_n = max(8, _round_up(min(tile_n, n), 8))

    # Pad N to a multiple of tile_n instead of asserting divisibility.
    n_pad = _round_up(n, tile_n)
    if n_pad != n:
        pos2d = jnp.pad(pos2d, ((0, n_pad - n), (0, 0)))
    grid = (n_pad // tile_n,)

    out2d = pl.pallas_call(
        functools.partial(_fourier_kernel, pos_dim=pos_dim),
        out_shape=jax.ShapeDtypeStruct((n_pad, f_dim), out_dtype),
        grid_spec=pltpu.PrefetchScalarGridSpec(
            num_scalar_prefetch=0,
            grid=grid,
            in_specs=[
                pl.BlockSpec((tile_n, pos_dim), lambda i: (i, 0)),
                pl.BlockSpec((pos_dim, enc_dim), lambda i: (0, 0)),
            ],
            out_specs=pl.BlockSpec((tile_n, f_dim), lambda i: (i, 0)),
        ),
        compiler_params=pltpu.CompilerParams(
            dimension_semantics=("parallel",),  # megacore-shardable on v7x
        ),
    )(pos2d, B)

    if n_pad != n:
        out2d = out2d[:n]
    return out2d.reshape(*lead, f_dim)


if __name__ == "__main__":
    # Module config (synthetic, deterministic init — no checkpoint load).
    pos_dim = 4
    f_dim = 32          # must be even
    enc_dim = f_dim // 2
    sigma = 10.0

    key = jax.random.PRNGKey(0)
    k_b, k_pos, k_pos2 = jax.random.split(key, 3)

    # self.B = torch.randn([pos_dim, enc_dim]) * sigma
    B = jax.random.normal(k_b, (pos_dim, enc_dim), dtype=jnp.float32) * sigma

    # Example positions: batch=2, seq=8, pos_dim=4
    pos = jax.random.normal(k_pos, (2, 8, pos_dim), dtype=jnp.float32)

    out = fourier_features(pos, B)
    out = jax.block_until_ready(out)

    ref_enc = pos @ B
    ref = jnp.concatenate([jnp.sin(ref_enc), jnp.cos(ref_enc)], axis=-1)
    assert out.shape == (2, 8, f_dim)
    assert jnp.allclose(out, ref, atol=1e-5, rtol=1e-5)

    # Exercise the padded-tail / multi-step grid path (N=15 rows, tile_n=8).
    pos_tail = jax.random.normal(k_pos2, (3, 5, pos_dim), dtype=jnp.float32)
    out_tail = jax.block_until_ready(fourier_features(pos_tail, B, tile_n=8))
    ref_enc_t = pos_tail @ B
    ref_t = jnp.concatenate([jnp.sin(ref_enc_t), jnp.cos(ref_enc_t)], axis=-1)
    assert out_tail.shape == (3, 5, f_dim)
    assert jnp.allclose(out_tail, ref_t, atol=1e-5, rtol=1e-5)

    print("KERNEL_OK")
</pallas_src>

<mosaic_0001>
module attributes {stable_mosaic.version = 11 : i64} {
  func.func @_fourier_kernel(%arg0: i32, %arg1: memref<16x4xf32, #tpu.memory_space<vmem>>, %arg2: memref<4x16xf32, #tpu.memory_space<vmem>>, %arg3: memref<16x32xf32, #tpu.memory_space<vmem>>) attributes {dimension_semantics = [#tpu.dimension_semantics<parallel>], iteration_bounds = array<i64: 1>, scalar_prefetch = 0 : i64, scratch_operands = 0 : i64, tpu.core_type = #tpu.core_type<tc>, window_params = [{transform_indices = @transform_0, window_bounds = array<i64: 16, 4>}, {pipeline_mode = #tpu.pipeline_mode<synchronous>, transform_indices = @transform_1, window_bounds = array<i64: 4, 16>}, {transform_indices = @transform_2, window_bounds = array<i64: 16, 32>}]} {
    %c0 = arith.constant 0 : index
    %c0_0 = arith.constant 0 : index
    %0 = vector.load %arg1[%c0, %c0_0] : memref<16x4xf32, #tpu.memory_space<vmem>>, vector<16x4xf32>
    %c0_1 = arith.constant 0 : index
    %c0_2 = arith.constant 0 : index
    %1 = vector.load %arg2[%c0_1, %c0_2] : memref<4x16xf32, #tpu.memory_space<vmem>>, vector<4x16xf32>
    %2 = vector.extract_strided_slice %0 {offsets = [0, 0], sizes = [16, 1], strides = [1, 1]} : vector<16x4xf32> to vector<16x1xf32>
    %3 = vector.extract_strided_slice %1 {offsets = [0, 0], sizes = [1, 16], strides = [1, 1]} : vector<4x16xf32> to vector<1x16xf32>
    %4 = vector.broadcast %2 : vector<16x1xf32> to vector<16x16xf32>
    %5 = vector.broadcast %3 : vector<1x16xf32> to vector<16x16xf32>
    %6 = arith.mulf %4, %5 : vector<16x16xf32>
    %7 = vector.extract_strided_slice %0 {offsets = [0, 1], sizes = [16, 1], strides = [1, 1]} : vector<16x4xf32> to vector<16x1xf32>
    %8 = vector.extract_strided_slice %1 {offsets = [1, 0], sizes = [1, 16], strides = [1, 1]} : vector<4x16xf32> to vector<1x16xf32>
    %9 = vector.broadcast %7 : vector<16x1xf32> to vector<16x16xf32>
    %10 = vector.broadcast %8 : vector<1x16xf32> to vector<16x16xf32>
    %11 = arith.mulf %9, %10 : vector<16x16xf32>
    %12 = arith.addf %6, %11 : vector<16x16xf32>
    %13 = vector.extract_strided_slice %0 {offsets = [0, 2], sizes = [16, 1], strides = [1, 1]} : vector<16x4xf32> to vector<16x1xf32>
    %14 = vector.extract_strided_slice %1 {offsets = [2, 0], sizes = [1, 16], strides = [1, 1]} : vector<4x16xf32> to vector<1x16xf32>
    %15 = vector.broadcast %13 : vector<16x1xf32> to vector<16x16xf32>
    %16 = vector.broadcast %14 : vector<1x16xf32> to vector<16x16xf32>
    %17 = arith.mulf %15, %16 : vector<16x16xf32>
    %18 = arith.addf %12, %17 : vector<16x16xf32>
    %19 = vector.extract_strided_slice %0 {offsets = [0, 3], sizes = [16, 1], strides = [1, 1]} : vector<16x4xf32> to vector<16x1xf32>
    %20 = vector.extract_strided_slice %1 {offsets = [3, 0], sizes = [1, 16], strides = [1, 1]} : vector<4x16xf32> to vector<1x16xf32>
    %21 = vector.broadcast %19 : vector<16x1xf32> to vector<16x16xf32>
    %22 = vector.broadcast %20 : vector<1x16xf32> to vector<16x16xf32>
    %23 = arith.mulf %21, %22 : vector<16x16xf32>
    %24 = arith.addf %18, %23 : vector<16x16xf32>
    %25 = math.sin %24 : vector<16x16xf32>
    %26 = math.cos %24 : vector<16x16xf32>
    %27 = tpu.concatenate %25, %26 in 1 : vector<16x16xf32>, vector<16x16xf32> -> vector<16x32xf32>
    %c0_3 = arith.constant 0 : index
    %c0_4 = arith.constant 0 : index
    %28 = vector.load %arg3[%c0_3, %c0_4] : memref<16x32xf32, #tpu.memory_space<vmem>>, vector<16x32xf32>
    tpu.vector_store %arg3[%c0_3, %c0_4], %27 {strides = array<i32>} : memref<16x32xf32, #tpu.memory_space<vmem>>, vector<16x32xf32>,
    return
  }
  func.func @transform_0(%arg0: i32) -> (i32, i32) {
    %c0_i32 = arith.constant 0 : i32
    %c0_i32_0 = arith.constant 0 : i32
    return %arg0, %c0_i32 : i32, i32
  }
  func.func @transform_1(%arg0: i32) -> (i32, i32) {
    %c0_i32 = arith.constant 0 : i32
    %c0_i32_0 = arith.constant 0 : i32
    %c0_i32_1 = arith.constant 0 : i32
    return %c0_i32, %c0_i32_0 : i32, i32
  }
  func.func @transform_2(%arg0: i32) -> (i32, i32) {
    %c0_i32 = arith.constant 0 : i32
    %c0_i32_0 = arith.constant 0 : i32
    return %arg0, %c0_i32 : i32, i32
  }
}

</mosaic_0001>

<bundles_post_ra>
// kernel: tpu_custom_call.1
= control target key start
LH: loop header
LB: loop body
LE: loop exit
PB: predicated region body
PF: predicated region fallthrough
CT: control target
= control target key end

     0   :  { %v774_v1 = vmov 1   ;;  %v775_v2 = vmov 0   ;;  %s990_s0 = inlined_call_operand.vmem [shape: f32[16,4], index: 0, kind: input, shape index: {}]   ;;  %s991_s1 = inlined_call_operand.vmem [shape: f32[4,16], index: 1, kind: input, shape index: {}]   ;;  %s992_s2 = inlined_call_operand.hbm [shape: f32[16,32], index: 2, kind: output, shape index: {}]  }
   0x1   :  { %v12_v0 = vld [vmem:[%s990_s0] sm:$0xff]  ;;  %744 = vset.pattern.permute.xlu1 %v774_v1  ;;  %743 = vset.pattern.permute.xlu0 %v775_v2 }
   0x2   :  { %7 = vsyncpa [#allocation3], 0  ;;  %29 = vperm.xlu1 %744, %v12_v0   ;;  %17 = vperm.xlu0 %743, %v12_v0   ;;  %v776_v3 = vmov 2   ;;  %v13_v4 = vld [vmem:[%s990_s0 + $0x8] sm:$0xff]  ;;  %v777_v5 = vmov 3   ;;  %s784_s0 = smov 16  }
   0x3   :  { %745 = vset.pattern.permute.xlu2 %v776_v3  ;;  %v14_v8 = vld [vmem:[%s991_s1] sm:$0xf]  ;;  %v778_v54 = vmov 2102212464   ;;  %v779_v59 = vmov 920167782  }
   0x4   :  { %42 = vperm.xlu2 %745, %v12_v0   ;;  %v36_v10 = vperm.slane %v14_v8, 1  ;;  %v25_v11 = vperm.slane %v14_v8, 0  ;;  %v49_v14 = vperm.slane %v14_v8, 2  ;;  %v62_v23 = vperm.slane %v14_v8, 3  ;;  %s785_s1 = smov [#allocation2]   ;;  %s705_s18 = sshll.u32 %s992_s2, 4  ;;  %s706_s18 = int_to_ptr.hbm [resolvable:$true] %s705_s18 }
   0x5   :  { %v780_v62 = vmov 1326507024   ;;  %v781_v3 = vmov 683565275   ;;  %s703_s15 = sshll.u32 %s785_s1, 4  ;;  %s786_s19 = smov 128   ;;  %s704_s15 = int_to_ptr.vmem [resolvable:$true] %s703_s15 }
   0x6   :  { %s787_s20 = smov 8  }
   0xa   :  { %33 = vperm.xlu1 %744, %v13_v4   ;;  %22 = vperm.xlu0 %743, %v13_v4  }
   0xc   :  { %46 = vperm.xlu2 %745, %v13_v4  }
  0x12   :  { %747 = vset.pattern.permute.xlu1 %v777_v5  ;;  %746 = vset.pattern.permute.xlu0 %v777_v5  ;;  %v782_v5 = vmov 2475754826  }
  0x13   :  { %59 = vperm.xlu1 %747, %v13_v4   ;;  %55 = vperm.xlu0 %746, %v12_v0  }
  0x5e   :  { %v43_v9 = vpop.permute.xlu2 %42 }
  0x5f   :  { %v50_v20 = vmul.f32 %v49_v14, %v43_v9 }
  0x66   :  { %v47_v19 = vpop.permute.xlu2 %46 }
  0x67   :  { %v51_v24 = vmul.f32 %v49_v14, %v47_v19 }
  0x74   :  { %v30_v6 = vpop.permute.xlu1 %29  ;;  %v18_v7 = vpop.permute.xlu0 %17 }
  0x75   :  { %v37_v15 = vmul.f32 %v36_v10, %v30_v6  ;;  %v26_v16 = vmul.f32 %v25_v11, %v18_v7 }
  0x77   :  { %v39_v21 = vadd.f32 %v37_v15, %v26_v16 }
  0x79   :  { %v52_v29 = vadd.f32 %v50_v20, %v39_v21 }
  0x7c   :  { %v34_v12 = vpop.permute.xlu1 %33  ;;  %v23_v13 = vpop.permute.xlu0 %22 }
  0x7d   :  { %v38_v17 = vmul.f32 %v36_v10, %v34_v12  ;;  %v27_v18 = vmul.f32 %v25_v11, %v23_v13  ;;  %v783_v10 = vmov 2131351028  }
  0x7f   :  { %v40_v22 = vadd.f32 %v38_v17, %v27_v18 }
  0x81   :  { %v53_v27 = vadd.f32 %v51_v24, %v40_v22 }
  0x85   :  { %v60_v25 = vpop.permute.xlu1 %59  ;;  %v56_v26 = vpop.permute.xlu0 %55 }
  0x86   :  { %v64_v28 = vmul.f32 %v62_v23, %v60_v25  ;;  %v63_v30 = vmul.f32 %v62_v23, %v56_v26 }
  0x88   :  { %v813_v31 = vadd.f32 %v64_v28, %v53_v27  ;;  %v815_v32 = vadd.f32 %v63_v30, %v52_v29 }
  0x8a   :  { %v225_v33 = vand.u32 2139095040, %v813_v31  ;;  %v70_v34 = vand.u32 2139095040, %v815_v32  ;;  %v222_v35 = vand.u32 2147483647, %v813_v31  ;;  %v67_v36 = vand.u32 2147483647, %v815_v32 }
  0x8c   :  { %v226_v37 = vshrl.u32 %v225_v33, 23  ;;  %v71_v38 = vshrl.u32 %v70_v34, 23  ;;  %v229_v39 = vand.u32 8388607, %v222_v35  ;;  %v74_v43 = vand.u32 8388607, %v67_v36 }
  0x8e   :  { %v720_v40 = vadd.s32 4294967169, %v226_v37  ;;  %v717_v41 = vadd.s32 4294967169, %v71_v38  ;;  %v230_v42 = vor.u32 8388608, %v229_v39  ;;  %v75_v49 = vor.u32 8388608, %v74_v43 }
  0x90   :  { %v232_v44 = vadd.s32 1, %v720_v40  ;;  %v77_v45 = vadd.s32 1, %v717_v41  ;;  %v825_v48 = vshll.u32 %v230_v42, 8  ;;  %v836_v58 = vshll.u32 %v75_v49, 8 }
  0x92   :  { %vm233_vm0 = vcmp.gt.s32.totalorder %v232_v44, 0  ;;  %vm78_vm1 = vcmp.gt.s32.totalorder %v77_v45, 0  ;;  %v271_v57 = vand.u32 65535, %v825_v48  ;;  %v272_v22 = vshrl.u32 %v825_v48, 16 }
  0x93   :  { %v234_v46 = vsel %vm233_vm0, %v232_v44, 0  ;;  %v79_v47 = vsel %vm78_vm1, %v77_v45, 0 }
  0x94   :  { %v827_v50 = vshrl.u32 %v234_v46, 5  ;;  %v236_v51 = vand.u32 31, %v234_v46  ;;  %v829_v52 = vand.u32 31, %v79_v47  ;;  %v852_v20 = vshrl.u32 %v79_v47, 5 }
  0x96   :  { %v237_v53 = vsub.s32 32, %v236_v51  ;;  %v248_v55 = vshll.u32 %v778_v54, %v236_v51  ;;  %v833_v56 = vsub.s32 32, %v829_v52  ;;  %v251_v61 = vshll.u32 %v779_v59, %v236_v51 }
  0x97   :  { %vm257_vm2 = vcmp.lt.s32.totalorder %v827_v50, 4  ;;  %v239_v4 = vshll.u32 %v781_v3, %v236_v51  ;;  %v242_v9 = vshll.u32 %v782_v5, %v236_v51  ;;  %v93_v12 = vshll.u32 %v778_v54, %v829_v52 }
  0x98   :  { %v249_v60 = vshrl.u32 %v779_v59, %v237_v53  ;;  %v252_v63 = vshrl.u32 %v780_v62, %v237_v53  ;;  %v94_v0 = vshrl.u32 %v779_v59, %v833_v56  ;;  %v97_v1 = vshrl.u32 %v780_v62, %v833_v56 }
  0x99   :  { %v240_v6 = vshrl.u32 %v782_v5, %v237_v53  ;;  %v243_v11 = vshrl.u32 %v783_v10, %v237_v53  ;;  %v245_v14 = vshll.u32 %v783_v10, %v236_v51  ;;  %v246_v15 = vshrl.u32 %v778_v54, %v237_v53 }
  0x9a   :  { %v250_v7 = vor.u32 %v249_v60, %v248_v55  ;;  %v253_v8 = vor.u32 %v252_v63, %v251_v61  ;;  %v96_v18 = vshll.u32 %v779_v59, %v829_v52  ;;  %vm254_vm3 = vcmp.lt.s32.totalorder %v827_v50, 1 }
  0x9b   :  { %v241_v13 = vor.u32 %v240_v6, %v239_v4  ;;  %v244_v19 = vor.u32 %v243_v11, %v242_v9  ;;  %v247_v21 = vor.u32 %v246_v15, %v245_v14  ;;  %v856_v23 = vor.u32 %v94_v0, %v93_v12 }
  0x9c   :  { %v263_v16 = vsel %vm257_vm2, %v250_v7, 920167782  ;;  %v267_v17 = vsel %vm257_vm2, %v253_v8, 1326507024  ;;  %v98_v24 = vor.u32 %v97_v1, %v96_v18  ;;  %vm256_vm4 = vcmp.lt.s32.totalorder %v827_v50, 3 }
  0x9d   :  { %v262_v25 = vsel %vm254_vm3, %v241_v13, %v244_v19  ;;  %vm255_vm5 = vcmp.lt.s32.totalorder %v827_v50, 2  ;;  %v264_v26 = vsel %vm256_vm4, %v247_v21, %v263_v16  ;;  %v266_v27 = vsel %vm254_vm3, %v244_v19, %v247_v21 }
  0x9e   :  { %v268_v28 = vsel %vm256_vm4, %v250_v7, %v267_v17  ;;  %v238_v29 = vshrl.u32 %v781_v3, %v237_v53  ;;  %v259_v30 = vsel %vm257_vm2, %v247_v21, 2102212464  ;;  %v265_v33 = vsel %vm255_vm5, %v262_v25, %v264_v26 }
  0x9f   :  { %v269_v34 = vsel %vm255_vm5, %v266_v27, %v268_v28  ;;  %vm102_vm6 = vcmp.lt.s32.totalorder %v852_v20, 4  ;;  %v295_v39 = vand.u32 65535, %v265_v33  ;;  %v296_v43 = vshrl.u32 %v265_v33, 16 }
  0xa0   :  { %v273_v37 = vand.u32 65535, %v269_v34  ;;  %v274_v38 = vshrl.u32 %v269_v34, 16  ;;  %v108_v40 = vsel %vm102_vm6, %v856_v23, 920167782  ;;  %v112_v41 = vsel %vm102_vm6, %v98_v24, 1326507024 }
  0xa1   :  { %v258_v42 = vsel %vm254_vm3, %v238_v29, %v241_v13  ;;  %v260_v44 = vsel %vm256_vm4, %v244_v19, %v259_v30  ;;  %v84_v47 = vshll.u32 %v781_v3, %v829_v52  ;;  %v298_v49 = vmul.u32 %v296_v43, %v271_v57 }
  0xa2   :  { %v276_v45 = vmul.u32 %v274_v38, %v271_v57  ;;  %v277_v46 = vmul.u32 %v273_v37, %v272_v22  ;;  %v299_v51 = vmul.u32 %v295_v39, %v272_v22  ;;  %v85_v53 = vshrl.u32 %v782_v5, %v833_v56 }
  0xa3   :  { %v87_v55 = vshll.u32 %v782_v5, %v829_v52  ;;  %v275_v59 = vmul.u32 %v273_v37, %v271_v57  ;;  %v278_v60 = vmul.u32 %v274_v38, %v272_v22  ;;  %v297_v62 = vmul.u32 %v295_v39, %v271_v57 }
  0xa4   :  { %v279_v61 = vshll.u32 %v276_v45, 16  ;;  %v280_v63 = vshrl.u32 %v276_v45, 16  ;;  %v281_v0 = vshll.u32 %v277_v46, 16  ;;  %v300_v1 = vmul.u32 %v296_v43, %v272_v22 }
  0xa5   :  { %v301_v4 = vshll.u32 %v298_v49, 16  ;;  %v303_v7 = vshll.u32 %v299_v51, 16  ;;  %v88_v8 = vshrl.u32 %v783_v10, %v833_v56  ;;  %v892_v12 = vor.u32 %v85_v53, %v84_v47 }
  0xa6   :  { %vm283_vm7 = vc.u32 %v275_v59, %v279_v61  ;;  %v285_v6 = vadd.s32 %v279_v61, %v275_v59  ;;  %v282_v14 = vshrl.u32 %v277_v46, 16  ;;  %v90_v19 = vshll.u32 %v783_v10, %v829_v52 }
  0xa7   :  { %v284_v9 = vsel %vm283_vm7, 1, %v775_v2  ;;  %vm305_vm8 = vc.u32 %v297_v62, %v301_v4  ;;  %v307_v11 = vadd.s32 %v301_v4, %v297_v62  ;;  %v895_v13 = vor.u32 %v88_v8, %v87_v55 }
  0xa8   :  { %v286_v5 = vadd.s32 %v284_v9, %v278_v60  ;;  %vm287_vm9 = vc.u32 %v285_v6, %v281_v0  ;;  %v306_v57 = vsel %vm305_vm8, 1, %v775_v2  ;;  %v91_v21 = vshrl.u32 %v778_v54, %v833_v56 }
  0xa9   :  { %v288_v15 = vsel %vm287_vm9, 1, %v775_v2  ;;  %v308_v16 = vadd.s32 %v306_v57, %v300_v1  ;;  %vm309_vm10 = vc.u32 %v307_v11, %v303_v7  ;;  %v302_v22 = vshrl.u32 %v298_v49, 16 }
  0xaa   :  { %v290_v17 = vadd.s32 %v288_v15, %v286_v5  ;;  %v310_v18 = vsel %vm309_vm10, 1, %v775_v2  ;;  %vm99_vm11 = vcmp.lt.s32.totalorder %v852_v20, 1  ;;  %vm101_vm12 = vcmp.lt.s32.totalorder %v852_v20, 3 }
  0xab   :  { %v312_v24 = vadd.s32 %v310_v18, %v308_v16  ;;  %v92_v26 = vor.u32 %v91_v21, %v90_v19  ;;  %v107_v27 = vsel %vm99_vm11, %v892_v12, %v895_v13  ;;  %v113_v52 = vsel %vm101_vm12, %v856_v23, %v112_v41 }
  0xac   :  { %v291_v25 = vadd.s32 %v290_v17, %v280_v63  ;;  %v304_v10 = vshrl.u32 %v299_v51, 16  ;;  %v912_v28 = vadd.s32 %v307_v11, %v303_v7  ;;  %vm100_vm13 = vcmp.lt.s32.totalorder %v852_v20, 2 }
  0xad   :  { %v313_v54 = vadd.s32 %v312_v24, %v302_v22  ;;  %v109_v30 = vsel %vm101_vm12, %v92_v26, %v108_v40  ;;  %v111_v33 = vsel %vm99_vm11, %v895_v13, %v92_v26  ;;  %v261_v34 = vsel %vm255_vm5, %v258_v42, %v260_v44 }
  0xae   :  { %v914_v29 = vadd.s32 %v291_v25, %v282_v14  ;;  %v110_v23 = vsel %vm100_vm13, %v107_v27, %v109_v30  ;;  %v114_v38 = vsel %vm100_vm13, %v111_v33, %v113_v52  ;;  %v116_v39 = vand.u32 65535, %v836_v58 }
  0xaf   :  { %v314_v37 = vadd.s32 %v313_v54, %v304_v10  ;;  %v117_v40 = vshrl.u32 %v836_v58, 16  ;;  %v118_v41 = vand.u32 65535, %v114_v38  ;;  %v119_v45 = vshrl.u32 %v114_v38, 16 }
  0xb0   :  { %vm317_vm14 = vc.u32 %v914_v29, %v912_v28  ;;  %v140_v46 = vand.u32 65535, %v110_v23  ;;  %v141_v50 = vshrl.u32 %v110_v23, 16  ;;  %v315_v42 = vmul.u32 %v825_v48, %v261_v34 }
  0xb1   :  { %v318_v43 = vadd.s32 1, %v314_v37  ;;  %v121_v47 = vmul.u32 %v119_v45, %v116_v39  ;;  %v122_v49 = vmul.u32 %v118_v41, %v117_v40  ;;  %v120_v55 = vmul.u32 %v118_v41, %v116_v39 }
  0xb2   :  { %v143_v53 = vmul.u32 %v141_v50, %v116_v39  ;;  %v144_v60 = vmul.u32 %v140_v46, %v117_v40  ;;  %v123_v62 = vmul.u32 %v119_v45, %v117_v40  ;;  %v142_v63 = vmul.u32 %v140_v46, %v116_v39 }
  0xb3   :  { %v319_v44 = vsel %vm317_vm14, %v318_v43, %v314_v37  ;;  %v124_v59 = vshll.u32 %v121_v47, 16  ;;  %v126_v1 = vshll.u32 %v122_v49, 16  ;;  %v145_v6 = vmul.u32 %v141_v50, %v117_v40 }
  0xb4   :  { %v320_v51 = vadd.s32 %v319_v44, %v315_v42  ;;  %v146_v0 = vshll.u32 %v143_v53, 16  ;;  %v148_v11 = vshll.u32 %v144_v60, 16  ;;  %v104_v16 = vsel %vm102_vm6, %v92_v26, 2102212464 }
  0xb5   :  { %vm128_vm15 = vc.u32 %v120_v55, %v124_v59  ;;  %v130_v4 = vadd.s32 %v124_v59, %v120_v55  ;;  %v125_v17 = vshrl.u32 %v121_v47, 16  ;;  %v83_v21 = vshrl.u32 %v781_v3, %v833_v56 }
  0xb6   :  { %v321_v61 = vadd.s32 536870912, %v320_v51  ;;  %v129_v48 = vsel %vm128_vm15, 1, %v775_v2  ;;  %vm150_vm0 = vc.u32 %v142_v63, %v146_v0  ;;  %v152_v8 = vadd.s32 %v146_v0, %v142_v63 }
  0xb7   :  { %v131_v9 = vadd.s32 %v129_v48, %v123_v62  ;;  %vm132_vm1 = vc.u32 %v130_v4, %v126_v1  ;;  %v151_v5 = vsel %vm150_vm0, 1, %v775_v2  ;;  %v127_v24 = vshrl.u32 %v122_v49, 16 }
  0xb8   :  { %v933_v7 = vshrl.u32 %v321_v61, 30  ;;  %v133_v14 = vsel %vm132_vm1, 1, %v775_v2  ;;  %v153_v15 = vadd.s32 %v151_v5, %v145_v6  ;;  %vm154_vm2 = vc.u32 %v152_v8, %v148_v11 }
  0xb9   :  { %v135_v18 = vadd.s32 %v133_v14, %v131_v9  ;;  %v155_v22 = vsel %vm154_vm2, 1, %v775_v2  ;;  %v147_v27 = vshrl.u32 %v143_v53, 16  ;;  %v103_v54 = vsel %vm99_vm11, %v83_v21, %v892_v12 }
  0xba   :  { %v323_v57 = vshll.u32 %v933_v7, 30  ;;  %v157_v52 = vadd.s32 %v155_v22, %v153_v15  ;;  %v105_v26 = vsel %vm101_vm12, %v895_v13, %v104_v16  ;;  %v149_v33 = vshrl.u32 %v144_v60, 16 }
  0xbb   :  { %v136_v25 = vadd.s32 %v135_v18, %v125_v17  ;;  %v156_v3 = vadd.s32 %v152_v8, %v148_v11  ;;  %v106_v37 = vsel %vm100_vm13, %v103_v54, %v105_v26  ;;  %v316_v13 = vadd.s32 %v912_v28, %v914_v29 }
  0xbc   :  { %v324_v19 = vsub.s32 %v320_v51, %v323_v57  ;;  %v158_v34 = vadd.s32 %v157_v52, %v147_v27  ;;  %v160_v40 = vmul.u32 %v836_v58, %v106_v37  ;;  %vm224_vm7 = vcmp.lt.s32.totalorder %v813_v31, 0 }
  0xbd   :  { %v137_v30 = vadd.s32 %v136_v25, %v127_v24  ;;  %v346_v0 = vsub.s32 4, %v933_v7  ;;  %vm223_vm8 = vcmp.le.f32.partialorder %v222_v35, 0.7853982  ;;  %vm69_vm10 = vcmp.lt.s32.totalorder %v815_v32, 0 }
  0xbe   :  { %vm325_vm3 = vcmp.lt.s32.totalorder %v324_v19, 0  ;;  %v326_v10 = vsub.s32 0, %v324_v19  ;;  %v159_v23 = vadd.s32 %v158_v34, %v149_v33  ;;  %vm967_vm13 = vcmp.le.f32.partialorder %v67_v36, 0.7853982 }
  0xbf   :  { %vm162_vm4 = vc.u32 %v137_v30, %v156_v3  ;;  %v347_v8 = vsel %vm224_vm7, %v346_v0, %v933_v7  ;;  %v161_v57 = vadd.s32 %v156_v3, %v137_v30  ;;  %vm365_vm2 = vweird.f32 %v813_v31 }
  0xc0   :  { %v327_v56 = vsel %vm325_vm3, %v326_v10, %v324_v19  ;;  %v163_v39 = vadd.s32 1, %v159_v23  ;;  %v349_v16 = vsel %vm223_vm8, 0, %v347_v8 }
  0xc1   :  { %v328_v2 = vclz %v327_v56  ;;  %v366_v25 = vadd.s32 3, %v349_v16  ;;  %v675_v30 = vand.u32 3, %v349_v16 }
  0xc2   :  { %v164_v12 = vsel %vm162_vm4, %v163_v39, %v159_v23 }
  0xc3   :  { %v721_v38 = vadd.s32 4294967294, %v328_v2  ;;  %v165_v43 = vadd.s32 %v164_v12, %v160_v40  ;;  %v367_v34 = vand.u32 3, %v366_v25  ;;  %vm676_vm12 = vcmp.lt.s32.totalorder %v675_v30, 2 }
  0xc4   :  { %vm677_vm14 = vcmp.eq.s32.totalorder %v675_v30, 0  ;;  %vm680_vm1 = vcmp.eq.s32.totalorder %v675_v30, 2 }
  0xc5   :  { %vm722_vm5 = vcmp.lt.s32.totalorder %v721_v38, 0  ;;  %v166_v50 = vadd.s32 536870912, %v165_v43  ;;  %vm372_vm11 = vcmp.eq.s32.totalorder %v367_v34, 2  ;;  %vm368_vm15 = vcmp.lt.s32.totalorder %v367_v34, 2 }
  0xc6   :  { %v331_v41 = vsel %vm722_vm5, 0, %v721_v38  ;;  %vm369_vm0 = vcmp.eq.s32.totalorder %v367_v34, 0 }
  0xc7   :  { %v332_v45 = vsub.s32 32, %v331_v41  ;;  %v336_v46 = vsub.s32 4294967266, %v331_v41  ;;  %v333_v42 = vshll.u32 %v324_v19, %v331_v41  ;;  %v955_v47 = vshrl.u32 %v166_v50, 30 }
  0xc9   :  { %v334_v44 = vshrl.u32 %v316_v13, %v332_v45  ;;  %v337_v20 = vadd.s32 127, %v336_v46  ;;  %v168_v53 = vshll.u32 %v955_v47, 30  ;;  %v191_v13 = vsub.s32 4, %v955_v47 }
  0xcb   :  { %v335_v49 = vor.u32 %v334_v44, %v333_v42  ;;  %v338_v51 = vshll.u32 %v337_v20, 23  ;;  %v169_v55 = vsub.s32 %v165_v43, %v168_v53 }
  0xcd   :  { %v339_v58 = vor.u32 4788187, %v338_v51  ;;  %v342_v60 = vcvt.s32.f32 %v335_v49  ;;  %vm170_vm6 = vcmp.lt.s32.totalorder %v169_v55, 0  ;;  %v171_v61 = vsub.s32 0, %v169_v55 }
  0xcf   :  { %v340_v59 = vand.u32 2147483647, %v339_v58  ;;  %v172_v28 = vsel %vm170_vm6, %v171_v61, %v169_v55  ;;  %v192_v58 = vsel %vm69_vm10, %v191_v13, %v955_v47 }
  0xd0   :  { %v173_v63 = vclz %v172_v28 }
  0xd1   :  { %v343_v62 = vmul.f32 %v342_v60, %v340_v59  ;;  %v194_v60 = vsel %vm967_vm13, 0, %v192_v58 }
  0xd2   :  { %v718_v4 = vadd.s32 4294967294, %v173_v63  ;;  %v521_v8 = vand.u32 3, %v194_v60 }
  0xd3   :  { %v344_v29 = vxor.u32 2147483648, %v343_v62 }
  0xd4   :  { %vm719_vm9 = vcmp.lt.s32.totalorder %v718_v4, 0  ;;  %vm522_vm5 = vcmp.lt.s32.totalorder %v521_v8, 2  ;;  %vm523_vm6 = vcmp.eq.s32.totalorder %v521_v8, 0 }
  0xd5   :  { %v345_v1 = vsel %vm224_vm7, %v344_v29, %v343_v62  ;;  %v176_v9 = vsel %vm719_vm9, 0, %v718_v4  ;;  %v211_v29 = vadd.s32 3, %v194_v60  ;;  %vm526_vm7 = vcmp.eq.s32.totalorder %v521_v8, 2 }
  0xd6   :  { %v348_v6 = vsel %vm223_vm8, %v813_v31, %v345_v1  ;;  %v177_v14 = vsub.s32 32, %v176_v9  ;;  %v181_v15 = vsub.s32 4294967266, %v176_v9  ;;  %v178_v21 = vshll.u32 %v169_v55, %v176_v9 }
  0xd7   :  { %v350_v48 = vmul.f32 %v348_v6, %v348_v6  ;;  %vm210_vm9 = vweird.f32 %v815_v32 }
  0xd8   :  { %v179_v19 = vshrl.u32 %v161_v57, %v177_v14  ;;  %v182_v35 = vadd.s32 127, %v181_v15 }
  0xd9   :  { %v351_v11 = vmul.f32 -0.001358992, %v350_v48  ;;  %v358_v5 = vmul.f32 -0.00019511016, %v350_v48 }
  0xda   :  { %v180_v27 = vor.u32 %v179_v19, %v178_v21  ;;  %v183_v52 = vshll.u32 %v182_v35, 23 }
  0xdb   :  { %v352_v17 = vadd.f32 0.041655596, %v351_v11  ;;  %v359_v18 = vadd.f32 0.008332121, %v358_v5 }
  0xdc   :  { %v184_v7 = vor.u32 4788187, %v183_v52  ;;  %v187_v3 = vcvt.s32.f32 %v180_v27 }
  0xdd   :  { %v353_v22 = vmul.f32 %v352_v17, %v350_v48  ;;  %v360_v24 = vmul.f32 %v359_v18, %v350_v48 }
  0xde   :  { %v185_v56 = vand.u32 2147483647, %v184_v7 }
  0xdf   :  { %v354_v10 = vadd.f32 -0.4999988, %v353_v22  ;;  %v361_v54 = vadd.f32 -0.16666654, %v360_v24 }
  0xe0   :  { %v188_v23 = vmul.f32 %v187_v3, %v185_v56 }
  0xe1   :  { %v355_v26 = vmul.f32 %v354_v10, %v350_v48  ;;  %v362_v33 = vmul.f32 %v361_v54, %v350_v48 }
  0xe2   :  { %v189_v12 = vxor.u32 2147483648, %v188_v23 }
  0xe3   :  { %v356_v2 = vadd.f32 1.0, %v355_v26  ;;  %v363_v37 = vadd.f32 1.0, %v362_v33 }
  0xe4   :  { %v190_v45 = vsel %vm69_vm10, %v189_v12, %v188_v23  ;;  %vm693_vm10 = vcmask 130048  }
  0xe5   :  { %v364_v38 = vmul.f32 %v363_v37, %v348_v6  ;;  %v373_v39 = vxor.u32 2147483648, %v356_v2  ;;  %v193_v36 = vsel %vm967_vm13, %v815_v32, %v190_v45  ;;  %v212_v6 = vand.u32 3, %v211_v29 }
  0xe6   :  { %v195_v49 = vmul.f32 %v193_v36, %v193_v36 }
  0xe7   :  { %v370_v41 = vxor.u32 2147483648, %v364_v38  ;;  %v374_v43 = vsel %vm372_vm11, %v373_v39, %v364_v38  ;;  %v682_v50 = vsel %vm680_vm1, %v373_v39, %v364_v38  ;;  %vm217_vm3 = vcmp.eq.s32.totalorder %v212_v6, 2 }
  0xe8   :  { %v196_v55 = vmul.f32 -0.001358992, %v195_v49  ;;  %v203_v59 = vmul.f32 -0.00019511016, %v195_v49  ;;  %vm214_vm4 = vcmp.eq.s32.totalorder %v212_v6, 0  ;;  %vm213_vm8 = vcmp.lt.s32.totalorder %v212_v6, 2 }
  0xe9   :  { %v679_v46 = vsel %vm677_vm14, %v356_v2, %v370_v41  ;;  %v371_v42 = vsel %vm369_vm0, %v356_v2, %v370_v41  ;;  %vm696_vm11 = vcmask 261120  }
  0xea   :  { %v683_v44 = vsel %vm676_vm12, %v679_v46, %v682_v50  ;;  %v375_v20 = vsel %vm368_vm15, %v371_v42, %v374_v43  ;;  %v197_v61 = vadd.f32 0.041655596, %v196_v55  ;;  %v204_v31 = vadd.f32 0.008332121, %v203_v59 }
  0xeb   :  { %v684_v51 = vsel %vm365_vm2, nan, %v683_v44  ;;  %v376_v53 = vsel %vm365_vm2, nan, %v375_v20 }
  0xec   :  { %689 = vrot.lane.b32.xlu1 %v684_v51, %s784_s0  ;;  %v198_v62 = vmul.f32 %v197_v61, %v195_v49  ;;  %v205_v28 = vmul.f32 %v204_v31, %v195_v49 }
  0xee   :  { %v199_v63 = vadd.f32 -0.4999988, %v198_v62  ;;  %v206_v0 = vadd.f32 -0.16666654, %v205_v28 }
  0xf0   :  { %v200_v1 = vmul.f32 %v199_v63, %v195_v49  ;;  %v207_v4 = vmul.f32 %v206_v0, %v195_v49 }
  0xf2   :  { %v201_v48 = vadd.f32 1.0, %v200_v1  ;;  %v208_v47 = vadd.f32 1.0, %v207_v4 }
  0xf4   :  { %v209_v9 = vmul.f32 %v208_v47, %v193_v36  ;;  %v218_v11 = vxor.u32 2147483648, %v201_v48 }
  0xf6   :  { %v215_v5 = vxor.u32 2147483648, %v209_v9  ;;  %v219_v57 = vsel %vm217_vm3, %v218_v11, %v209_v9  ;;  %v528_v15 = vsel %vm526_vm7, %v218_v11, %v209_v9 }
  0xf8   :  { %v525_v14 = vsel %vm523_vm6, %v201_v48, %v215_v5  ;;  %v216_v16 = vsel %vm214_vm4, %v201_v48, %v215_v5 }
  0xf9   :  { %v529_v17 = vsel %vm522_vm5, %v525_v14, %v528_v15  ;;  %v220_v18 = vsel %vm213_vm8, %v216_v16, %v219_v57 }
  0xfa   :  { %v530_v19 = vsel %vm210_vm9, nan, %v529_v17  ;;  %v221_v21 = vsel %vm210_vm9, nan, %v220_v18 }
  0xfb   :  { %687 = vrot.lane.b32.xlu2 %v530_v19, %s784_s0 }
 0x155   :  { %v688_v35 = vpop.permute.xlu2 %687 }
 0x156   :  { %v694_v22 = vsel %vm693_vm10, %v221_v21, %v688_v35 }
 0x157   :  { %697 = vst.msk [vmem:[#allocation2] sm:$0xff] %vm696_vm11, %v694_v22 }
 0x15e   :  { %v690_v32 = vpop.permute.xlu1 %689 }
 0x15f   :  { %v695_v24 = vsel %vm693_vm10, %v376_v53, %v690_v32 }
 0x160   :  { %698 = vst.msk [vmem:[#allocation2 + $0x8] sm:$0xff] %vm696_vm11, %v695_v24 }
 0x161   :  { %711 = dma.vmem_to_hbm [thread:$0]  %s704_s15, 256, %s706_s18, [#allocation3], %s786_s19, %s786_s19, %s787_s20  }
 0x162   :  { %772 = dma.done.wait [#allocation3], 256  }
 0x163   :  { %773 = vsyncadd [#allocation3], 4294967040 }
 0x164   :  { %716 = vsyncpa [#allocation3], 1 }

</bundles_post_ra>
